<compile_context>
chip_gen: v6e
topology: v6e:2x2x1
jax: 0.10.0
libtpu: 0.0.40
codegen_flags: <defaults>
</compile_context>

<pallas_src>
import math
import functools

import jax
import jax.numpy as jnp
from jax.experimental import pallas as pl
from jax.experimental.pallas import tpu as pltpu


def _round_up(n, m):
    return ((n + m - 1) // m) * m


# -----------------------------------------------------------------------------
# Fused kernel: grad norms + GradientModel.smooth + StopControl forward
# -----------------------------------------------------------------------------
def _gradient_stop_kernel(slab_ref, hx_ref, p_ref, gate_ref, hx_out_ref, *, p):
    # Static sizes recovered from ref shapes (wrapper guarantees the layout).
    r_ih = slab_ref.shape[0]          # rows of the grad slab == W_ih^T block rows
    H = hx_ref.shape[1]               # LSTM hidden size
    t0 = p_ref.shape[0] - 8           # start of the [b_sum; w_out; b_out] tail

    # ---- per-row grad sum-of-squares: VPU square + XLU lane reduce ------------
    g = slab_ref[...]                                   # (r_ih, L_pad), lane-dense
    sumsq = jnp.sum(g * g, axis=-1, keepdims=True)      # (r_ih, 1) column

    # ---- GradientModel.smooth, log channel only (sqrt folded into 0.5*log) ----
    # |x| < exp(-p)  <=>  sumsq < exp(-2p);  log(|x|+eps)/p ~= 0.5*log(sumsq)/p
    thresh2 = math.exp(-2.0 * p)
    x = jnp.where(sumsq < thresh2,
                  -1.0,
                  0.5 * jnp.log(jnp.maximum(sumsq, thresh2)) / p)   # (r_ih, 1)

    # ---- recurrent state: read BEFORE writing hx_out_ref (buffers may alias) ---
    hx = hx_ref[...]                                    # (2, H)
    h = hx[0:1, :]                                      # (1, H)
    c = hx[1:2, :]                                      # (1, H)

    # ---- single parameter slab, static slices ----------------------------------
    w_ih_t = p_ref[0:r_ih, :]                           # (r_ih, 4H), zero-padded rows
    w_hh_t = p_ref[r_ih:r_ih + H, :]                    # (H, 4H)
    tail = p_ref[t0:t0 + 8, :]                          # (8, 4H)
    b_row = tail[0:1, :]                                # (1, 4H)  = b_ih + b_hh
    w_out = tail[1:2, 0:H]                              # (1, H)
    b_out = tail[2:3, 0:1]                              # (1, 1)

    # ---- LSTMCell gates (PyTorch order i, f, g, o) ------------------------------
    # x-path: pure VPU/XLU (column broadcast-mul + sublane reduce); padded rows of
    # x (-1 from smooth(0)) hit zero rows of w_ih_t, contributing nothing.
    gates_x = jnp.sum(x * w_ih_t, axis=0, keepdims=True)             # (1, 4H)
    # h-path: the single remaining MXU push.
    gates_h = jnp.dot(h, w_hh_t, preferred_element_type=jnp.float32)  # (1, 4H)
    gates = gates_x + gates_h + b_row

    i_g = jax.nn.sigmoid(gates[:, 0 * H:1 * H])
    f_g = jax.nn.sigmoid(gates[:, 1 * H:2 * H])
    g_g = jnp.tanh(gates[:, 2 * H:3 * H])
    o_g = jax.nn.sigmoid(gates[:, 3 * H:4 * H])
    c_new = f_g * c + i_g * g_g
    h_new = o_g * jnp.tanh(c_new)

    # ---- output head (H -> 1): VPU multiply + lane reduce ----------------------
    logit = jnp.sum(h_new * w_out, axis=-1, keepdims=True) + b_out
    gate_ref[...] = jax.nn.sigmoid(logit)               # (1, 1)

    # ---- merged recurrent-state writeback (single aliased output operand) ------
    hx_out_ref[0:1, :] = h_new
    hx_out_ref[1:2, :] = c_new


# -----------------------------------------------------------------------------
# Parameter construction (PyTorch layout) + one-time kernel-layout preparation
# -----------------------------------------------------------------------------
def make_stop_control_params(key, input_size, hidden_size):
    """Shapes exactly as StopControl.__init__ (nn.LSTMCell + nn.Linear + h_0/c_0)."""
    k = jax.random.split(key, 6)
    bound = 1.0 / math.sqrt(hidden_size)
    return {
        "w_ih": jax.random.uniform(k[0], (4 * hidden_size, input_size),
                                   jnp.float32, -bound, bound),
        "w_hh": jax.random.uniform(k[1], (4 * hidden_size, hidden_size),
                                   jnp.float32, -bound, bound),
        "b_ih": jax.random.uniform(k[2], (4 * hidden_size,),
                                   jnp.float32, -bound, bound),
        "b_hh": jax.random.uniform(k[3], (4 * hidden_size,),
                                   jnp.float32, -bound, bound),
        "w_out": jax.random.uniform(k[4], (1, hidden_size),
                                    jnp.float32, -bound, bound),
        "b_out": jnp.zeros((1,), jnp.float32),        # bias.data.fill_(0.0)
        "h_0": jax.random.normal(k[5], (hidden_size,), jnp.float32),
        "c_0": jax.random.normal(jax.random.fold_in(k[5], 1),
                                 (hidden_size,), jnp.float32),
    }


def prepare_stop_control_params(raw):
    """One-time layout prep: transposes, bias sum, and packing of all weights
    into a SINGLE (round8(I)+H rounded + 8, 4H) f32 parameter slab."""
    w_ih = jnp.asarray(raw["w_ih"], jnp.float32)        # (4H, I)
    w_hh = jnp.asarray(raw["w_hh"], jnp.float32)        # (4H, H)
    four_h, in_size = w_ih.shape
    hidden = four_h // 4
    r_ih = _round_up(in_size, 8)                        # W_ih^T block rows
    t0 = _round_up(r_ih + hidden, 8)                    # tail block start (mult of 8)
    total = t0 + 8

    pslab = jnp.zeros((total, four_h), jnp.float32)
    pslab = pslab.at[0:in_size, :].set(w_ih.T)                       # rows [0, I)
    pslab = pslab.at[r_ih:r_ih + hidden, :].set(w_hh.T)              # rows [r_ih, r_ih+H)
    pslab = pslab.at[t0, :].set((raw["b_ih"] + raw["b_hh"]).astype(jnp.float32))
    pslab = pslab.at[t0 + 1, 0:hidden].set(jnp.asarray(raw["w_out"], jnp.float32)[0])
    pslab = pslab.at[t0 + 2, 0].set(jnp.asarray(raw["b_out"], jnp.float32).reshape(()))

    return {
        "pslab": pslab,                                  # (total, 4H)
        "h_0": jnp.asarray(raw["h_0"], jnp.float32),     # (H,)
        "c_0": jnp.asarray(raw["c_0"], jnp.float32),     # (H,)
    }


# -----------------------------------------------------------------------------
# GradientModel.stop (flexible_step=True, hidden_input=False branch)
# -----------------------------------------------------------------------------
def gradient_model_stop(params, loss, grads, stop_hx=None, *, p=10, eps=1e-20):
    """One stop-controller step: returns (stop_gate scalar, new (2, H) hx state)."""
    del eps  # folded into smooth(): negligible under the exp(-p) clamp
    pslab = params["pslab"]
    hidden = params["h_0"].shape[0]
    t0 = pslab.shape[0] - 8
    r_ih = ((t0 - hidden) // 8) * 8          # recover static W_ih^T block row count

    if stop_hx is None:
        stop_hx = jnp.stack([params["h_0"], params["c_0"]], axis=0)   # (2, H)

    n_params = len(grads)
    assert n_params + 1 <= r_ih, "more gradients than the stop controller expects"

    # Lane-dense grad slab: one flattened gradient per ROW (elements on lanes).
    # Reserved row `n_params` carries the raw loss in lane 0 (its sum-of-squares
    # is loss^2 -> |loss|, which gives the identical smooth() log-channel value).
    # Remaining rows are zero padding, matched by zero rows of W_ih^T in pslab.
    flat = [jnp.ravel(g).astype(jnp.float32) for g in grads]
    max_len = max(int(f.shape[0]) for f in flat)
    l_pad = max(128, _round_up(max_len, 128))
    rows = [jnp.pad(f, (0, l_pad - int(f.shape[0]))) for f in flat]
    loss_row = jnp.zeros((l_pad,), jnp.float32).at[0].set(
        jnp.asarray(loss, jnp.float32).reshape(()))
    rows.append(loss_row)
    rows.extend([jnp.zeros((l_pad,), jnp.float32)] * (r_ih - len(rows)))
    slab = jnp.stack(rows, axis=0)                      # (r_ih, l_pad)

    vmem = pl.BlockSpec(memory_space=pltpu.MemorySpace.VMEM)
    gate, hx_new = pl.pallas_call(
        functools.partial(_gradient_stop_kernel, p=float(p)),
        in_specs=[vmem, vmem, vmem],                    # slab, hx, param slab
        out_specs=(vmem, vmem),
        out_shape=(
            jax.ShapeDtypeStruct((1, 1), jnp.float32),
            jax.ShapeDtypeStruct((2, hidden), jnp.float32),
        ),
        # Recurrent state reuses its HBM buffer each step (realized by donation
        # of stop_hx at the jit boundary below).
        input_output_aliases={1: 1},
    )(slab, stop_hx, pslab)

    stop_gate = gate[0, 0]                              # matches .squeeze() on (1, 1)
    return stop_gate, hx_new


# TODO(synk): GradientModel.step_forward / forward / update (external
# recommendation model, loss_function, torch.autograd.grad, python-random
# negative sampling) and the hidden_input=True branch of stop() depend on
# submodules not defined in the module; only the concrete grad-norm / smooth /
# StopControl compute is implemented as the fused Pallas kernel above.


if __name__ == "__main__":
    key = jax.random.PRNGKey(0)

    # 7 learned linear params -> stop_input_size = 7 + 1 = 8, hidden_size = 16
    num_learned_params = 7
    input_size = num_learned_params + 1
    hidden_size = 2 * input_size

    pkey, gkey = jax.random.split(key)
    raw_params = make_stop_control_params(pkey, input_size, hidden_size)
    params = prepare_stop_control_params(raw_params)    # hoisted weight prep (once)

    # Synthetic per-parameter gradients and scalar losses.
    gkeys = jax.random.split(gkey, num_learned_params)
    grads = [jax.random.normal(gkeys[i], (8, 32), jnp.float32) * (0.1 * (i + 1))
             for i in range(num_learned_params)]

    # Donate the recurrent state so input_output_aliases={1:1} is actually
    # realized (no defensive copy of hx between steps).
    step_fn = jax.jit(gradient_model_stop, donate_argnums=(3,))

    # Step 0 (hx=None -> learned h_0/c_0), step 1 (recurrent state fed back,
    # donated and aliased in-place through the kernel).
    stop_gate0, hx = step_fn(params, jnp.float32(0.731), grads, None)
    stop_gate1, hx = step_fn(params, jnp.float32(0.512), grads, hx)
    jax.block_until_ready((stop_gate0, stop_gate1, hx))

    assert stop_gate0.shape == () and stop_gate1.shape == ()
    assert hx.shape == (2, hidden_size)
    for sg in (stop_gate0, stop_gate1):
        assert bool(jnp.isfinite(sg)) and 0.0 <= float(sg) <= 1.0

    print("KERNEL_OK")
</pallas_src>

<mosaic_0001>
module attributes {stable_mosaic.version = 11 : i64} {
  func.func @_gradient_stop_kernel(%arg0: memref<8x256xf32, #tpu.memory_space<vmem>>, %arg1: memref<2x16xf32, #tpu.memory_space<vmem>>, %arg2: memref<32x64xf32, #tpu.memory_space<vmem>>, %arg3: memref<1x1xf32, #tpu.memory_space<vmem>>, %arg4: memref<2x16xf32, #tpu.memory_space<vmem>>) attributes {dimension_semantics = [], scalar_prefetch = 0 : i64, scratch_operands = 0 : i64, tpu.core_type = #tpu.core_type<tc>} {
    %c0 = arith.constant 0 : index
    %c0_0 = arith.constant 0 : index
    %0 = vector.load %arg0[%c0, %c0_0] : memref<8x256xf32, #tpu.memory_space<vmem>>, vector<8x256xf32>
    %1 = arith.mulf %0, %0 : vector<8x256xf32>
    %cst = arith.constant dense<0.000000e+00> : vector<8xf32>
    %2 = vector.multi_reduction <add>, %1, %cst [1] : vector<8x256xf32> to vector<8xf32>
    %3 = vector.shape_cast %2 : vector<8xf32> to vector<8x1xf32>
    %cst_1 = arith.constant 2.06115369E-9 : f32
    %4 = vector.broadcast %cst_1 : f32 to vector<8x1xf32>
    %5 = arith.cmpf olt, %3, %4 : vector<8x1xf32>
    %cst_2 = arith.constant 2.06115369E-9 : f32
    %6 = vector.broadcast %cst_2 : f32 to vector<8x1xf32>
    %7 = arith.maximumf %3, %6 : vector<8x1xf32>
    %8 = math.log %7 : vector<8x1xf32>
    %cst_3 = arith.constant 5.000000e-01 : f32
    %9 = vector.broadcast %cst_3 : f32 to vector<8x1xf32>
    %10 = arith.mulf %9, %8 : vector<8x1xf32>
    %cst_4 = arith.constant 1.000000e+01 : f32
    %11 = vector.broadcast %cst_4 : f32 to vector<8x1xf32>
    %12 = arith.divf %10, %11 : vector<8x1xf32>
    %cst_5 = arith.constant -1.000000e+00 : f32
    %13 = vector.broadcast %cst_5 : f32 to vector<8x1xf32>
    %14 = arith.select %5, %13, %12 : vector<8x1xi1>, vector<8x1xf32>
    %c0_6 = arith.constant 0 : index
    %c0_7 = arith.constant 0 : index
    %15 = vector.load %arg1[%c0_6, %c0_7] : memref<2x16xf32, #tpu.memory_space<vmem>>, vector<2x16xf32>
    %16 = vector.extract_strided_slice %15 {offsets = [0, 0], sizes = [1, 16], strides = [1, 1]} : vector<2x16xf32> to vector<1x16xf32>
    %17 = vector.extract_strided_slice %15 {offsets = [1, 0], sizes = [1, 16], strides = [1, 1]} : vector<2x16xf32> to vector<1x16xf32>
    %c0_8 = arith.constant 0 : index
    %c0_9 = arith.constant 0 : index
    %18 = vector.load %arg2[%c0_8, %c0_9] : memref<32x64xf32, #tpu.memory_space<vmem>>, vector<8x64xf32>
    %c8 = arith.constant 8 : index
    %c0_10 = arith.constant 0 : index
    %19 = vector.load %arg2[%c8, %c0_10] : memref<32x64xf32, #tpu.memory_space<vmem>>, vector<16x64xf32>
    %c24 = arith.constant 24 : index
    %c0_11 = arith.constant 0 : index
    %20 = vector.load %arg2[%c24, %c0_11] : memref<32x64xf32, #tpu.memory_space<vmem>>, vector<8x64xf32>
    %21 = vector.extract_strided_slice %20 {offsets = [0, 0], sizes = [1, 64], strides = [1, 1]} : vector<8x64xf32> to vector<1x64xf32>
    %22 = vector.extract_strided_slice %20 {offsets = [1, 0], sizes = [1, 16], strides = [1, 1]} : vector<8x64xf32> to vector<1x16xf32>
    %23 = vector.extract_strided_slice %20 {offsets = [2, 0], sizes = [1, 1], strides = [1, 1]} : vector<8x64xf32> to vector<1x1xf32>
    %24 = vector.broadcast %14 : vector<8x1xf32> to vector<8x64xf32>
    %25 = arith.mulf %24, %18 : vector<8x64xf32>
    %cst_12 = arith.constant dense<0.000000e+00> : vector<64xf32>
    %26 = vector.multi_reduction <add>, %25, %cst_12 [0] : vector<8x64xf32> to vector<64xf32>
    %27 = vector.shape_cast %26 : vector<64xf32> to vector<1x64xf32>
    %cst_13 = arith.constant dense<0.000000e+00> : vector<1x64xf32>
    %28 = tpu.matmul %16, %19, %cst_13 {dimension_numbers = #tpu.dot_dimension_numbers<[1], [0], [0], [1], [0, 0, 1, 1], [], []>} : vector<1x16xf32>, vector<16x64xf32>, vector<1x64xf32> -> vector<1x64xf32>
    %29 = arith.addf %27, %28 : vector<1x64xf32>
    %30 = arith.addf %29, %21 : vector<1x64xf32>
    %31 = vector.extract_strided_slice %30 {offsets = [0, 0], sizes = [1, 16], strides = [1, 1]} : vector<1x64xf32> to vector<1x16xf32>
    %32 = arith.negf %31 : vector<1x16xf32>
    %33 = math.exp %32 : vector<1x16xf32>
    %cst_14 = arith.constant 1.000000e+00 : f32
    %34 = vector.broadcast %cst_14 : f32 to vector<1x16xf32>
    %35 = arith.addf %34, %33 : vector<1x16xf32>
    %36 = arith.divf %34, %35 : vector<1x16xf32>
    %37 = vector.extract_strided_slice %30 {offsets = [0, 16], sizes = [1, 16], strides = [1, 1]} : vector<1x64xf32> to vector<1x16xf32>
    %38 = arith.negf %37 : vector<1x16xf32>
    %39 = math.exp %38 : vector<1x16xf32>
    %cst_15 = arith.constant 1.000000e+00 : f32
    %40 = vector.broadcast %cst_15 : f32 to vector<1x16xf32>
    %41 = arith.addf %40, %39 : vector<1x16xf32>
    %42 = arith.divf %40, %41 : vector<1x16xf32>
    %43 = vector.extract_strided_slice %30 {offsets = [0, 32], sizes = [1, 16], strides = [1, 1]} : vector<1x64xf32> to vector<1x16xf32>
    %44 = math.tanh %43 : vector<1x16xf32>
    %45 = vector.extract_strided_slice %30 {offsets = [0, 48], sizes = [1, 16], strides = [1, 1]} : vector<1x64xf32> to vector<1x16xf32>
    %46 = arith.negf %45 : vector<1x16xf32>
    %47 = math.exp %46 : vector<1x16xf32>
    %cst_16 = arith.constant 1.000000e+00 : f32
    %48 = vector.broadcast %cst_16 : f32 to vector<1x16xf32>
    %49 = arith.addf %48, %47 : vector<1x16xf32>
    %50 = arith.divf %48, %49 : vector<1x16xf32>
    %51 = arith.mulf %42, %17 : vector<1x16xf32>
    %52 = arith.mulf %36, %44 : vector<1x16xf32>
    %53 = arith.addf %51, %52 : vector<1x16xf32>
    %54 = math.tanh %53 : vector<1x16xf32>
    %55 = arith.mulf %50, %54 : vector<1x16xf32>
    %56 = arith.mulf %55, %22 : vector<1x16xf32>
    %cst_17 = arith.constant dense<0.000000e+00> : vector<1xf32>
    %57 = vector.multi_reduction <add>, %56, %cst_17 [1] : vector<1x16xf32> to vector<1xf32>
    %58 = vector.shape_cast %57 : vector<1xf32> to vector<1x1xf32>
    %59 = arith.addf %58, %23 : vector<1x1xf32>
    %60 = arith.negf %59 : vector<1x1xf32>
    %61 = math.exp %60 : vector<1x1xf32>
    %cst_18 = arith.constant 1.000000e+00 : f32
    %62 = vector.broadcast %cst_18 : f32 to vector<1x1xf32>
    %63 = arith.addf %62, %61 : vector<1x1xf32>
    %64 = arith.divf %62, %63 : vector<1x1xf32>
    %c0_19 = arith.constant 0 : index
    %c0_20 = arith.constant 0 : index
    %65 = vector.load %arg3[%c0_19, %c0_20] : memref<1x1xf32, #tpu.memory_space<vmem>>, vector<1x1xf32>
    tpu.vector_store %arg3[%c0_19, %c0_20], %64 {strides = array<i32>} : memref<1x1xf32, #tpu.memory_space<vmem>>, vector<1x1xf32>,
    %c0_21 = arith.constant 0 : index
    %c0_22 = arith.constant 0 : index
    %66 = vector.load %arg4[%c0_21, %c0_22] : memref<2x16xf32, #tpu.memory_space<vmem>>, vector<1x16xf32>
    tpu.vector_store %arg4[%c0_21, %c0_22], %55 {strides = array<i32>} : memref<2x16xf32, #tpu.memory_space<vmem>>, vector<1x16xf32>,
    %c1 = arith.constant 1 : index
    %c0_23 = arith.constant 0 : index
    %67 = vector.load %arg4[%c1, %c0_23] : memref<2x16xf32, #tpu.memory_space<vmem>>, vector<1x16xf32>
    tpu.vector_store %arg4[%c1, %c0_23], %53 {strides = array<i32>} : memref<2x16xf32, #tpu.memory_space<vmem>>, vector<1x16xf32>,
    return
  }
}

</mosaic_0001>

<bundles_post_ra>
// kernel: gradient_model_stop.1
= control target key start
LH: loop header
LB: loop body
LE: loop exit
PB: predicated region body
PF: predicated region fallthrough
CT: control target
= control target key end

     0   :  { %v261_v2 = vmov 0.0   ;;  %vm262_vm0 = vmmov 0   ;;  %vm46_vm1 = vcmask 130048   ;;  %s327_s0 = inlined_call_operand.vmem [shape: f32[8,256], index: 0, kind: input, shape index: {}]   ;;  %s328_s1 = inlined_call_operand.vmem [shape: f32[2,16], index: 1, kind: input, shape index: {}, may-alias: {1,4}]   ;;  %s329_s2 = inlined_call_operand.vmem [shape: f32[32,64], index: 2, kind: input, shape index: {}]   ;;  %s330_s3 = inlined_call_operand.hbm [shape: f32[1,1], index: 3, kind: output, shape index: {0}]   ;;  %s331_s4 = inlined_call_operand.vmem [shape: f32[2,16], index: 4, kind: output, shape index: {1}, may-alias: {1,4}]  }
   0x1   :  { %v35_v0 = vld [vmem:[%s329_s2 + $0x10] sm:$0xff]  ;;  %v32_v1 = vld [vmem:[%s328_s1] sm:$0x3]  ;;  %209 = vmatprep.subr.mxu0 %v261_v2  ;;  %v34_v3 = vld [vmem:[%s329_s2 + $0x8] sm:$0xff]  ;;  %213 = vmatprep.mubr.msk.f32.mxu0 %vm262_vm0, %v261_v2 }
   0x2   :  { %v17_v4 = vld [vmem:[%s327_s0] sm:$0xff]  ;;  %v18_v5 = vld [vmem:[%s327_s0 + $0x8] sm:$0xff]  ;;  %v129_v6 = vrot.slane %v32_v1, 1  ;;  %210 = vmatpush3.msra.mxu0 %v35_v0 }
   0x3   :  { %v19_v7 = vmul.f32 %v17_v4, %v17_v4  ;;  %v20_v8 = vmul.f32 %v18_v5, %v18_v5 }
   0x4   :  { %10 = vsyncpa [#allocation3], 0  ;;  %211 = vmatprep.subr.mxu0 %v261_v2  ;;  %s263_s1 = smov 16   ;;  %v33_v16 = vld [vmem:[%s329_s2] sm:$0xff]  ;;  %vm38_vm3 = vcmask 523264   ;;  %v36_v26 = vld [vmem:[%s329_s2 + $0x18] sm:$0xff] }
   0x5   :  { %130 = vrot.lane.b32.xlu1 %v129_v6, %s263_s1  ;;  %212 = vmatpush3.msra.mxu0 %v34_v3  ;;  %v21_v9 = vadd.f32 %v20_v8, %v19_v7  ;;  %s264_s28 = smov 96   ;;  %s265_s2 = smov 32   ;;  %v151_v43 = vrot.slane %v36_v26, 1  ;;  %vm160_vm4 = vcmask 122880   ;;  %v164_v52 = vrot.slane %v36_v26, 2 }
   0x6   :  { %214 = vmatmul.mubr.msk.f32.vlgmr.msra.gmra.mxu0 %vm46_vm1, %v32_v1  ;;  %s266_s29 = smov 48   ;;  %s267_s30 = smov 80   ;;  %vm173_vm5 = vcmask 0  }
   0x7   :  { %22 = vadd.xlane.f32.xlu0 %v21_v9  ;;  %s268_s5 = smov 112   ;;  %s269_s10 = smov [#allocation2]  }
   0x8   :  { %s191_s11 = sshll.u32 %s269_s10, 4  ;;  %s192_s11 = int_to_ptr.vmem [resolvable:$true] %s191_s11 }
   0x9   :  { %s239_s12 = scalar_lea.vmem %s192_s11, 16  ;;  %s243_s13 = scalar_lea.vmem %s192_s11, 32 }
   0xa   :  { %p240_p0 = scmp.ne.s32.totalorder %s192_s11, %s239_s12  ;;  %p244_p1 = scmp.lt.s32.totalorder %s192_s11, %s192_s11 }
   0xb   :  { %p245_p2 = scmp.lt.s32.totalorder %s243_s13, %s239_s12 }
   0xd   :  { %p246_p3 = por %p245_p2, %p244_p1 }
   0xf   :  { %p247_p4 = pnand %p246_p3, %p240_p0 }
  0x77   :  { %v131_v38 = vpop.permute.xlu1 %130 }
  0x90   :  { %v23_v10 = vpop.xlane.xlu0 %22 }
  0x91   :  { %v25_v11 = vmax.f32 %v23_v10, 2.0611537e-09  ;;  %vm24_vm2 = vcmp.lt.f32.partialorder %v23_v10, 2.0611537e-09 }
  0x93   :  { %225 = vlog2.f32 %v25_v11 }
  0xa0   :  { %v226_v12 = vpop.eup %225 }
  0xa1   :  { %v27_v13 = vmul.f32 0.6931472, %v226_v12 }
  0xa3   :  { %v28_v14 = vmul.f32 0.5, %v27_v13 }
  0xa5   :  { %v30_v15 = vmul.f32 0.1, %v28_v14 }
  0xa7   :  { %v31_v17 = vsel %vm24_vm2, -1.0, %v30_v15 }
  0xa8   :  { %v37_v18 = vmul.f32 %v33_v16, %v31_v17 }
  0xaa   :  { %v39_v19 = vsel %vm38_vm3, %v37_v18, 0.0 }
  0xab   :  { %v40_v20 = vrot.slane %v39_v19, 4 }
  0xad   :  { %v41_v21 = vadd.f32 %v40_v20, %v39_v19 }
  0xaf   :  { %v42_v22 = vrot.slane %v41_v21, 2 }
  0xb1   :  { %v43_v23 = vadd.f32 %v42_v22, %v41_v21 }
  0xb3   :  { %v44_v24 = vrot.slane %v43_v23, 1 }
  0xb5   :  { %v45_v25 = vadd.f32 %v44_v24, %v43_v23 }
  0xc6   :  { %v116_v27 = vpop.f32.mrf.mxu0 }
  0xc7   :  { %v120_v28 = vadd.f32 %v116_v27, %v45_v25 }
  0xc8   :  { %v215_v29 = vpop.f32.mrf.mxu0 }
  0xc9   :  { %v121_v30 = vadd.f32 %v120_v28, %v36_v26 }
  0xcb   :  { %227 = vtanh.f32 %v121_v30  ;;  %v204_v32 = vmul.f32 -1.442695, %v121_v30 }
  0xcd   :  { %229 = vpow2.f32 %v204_v32 }
  0xd8   :  { %v228_v31 = vpop.eup %227 }
  0xd9   :  { %135 = vrot.lane.b32.xlu0 %v228_v31, %s264_s28 }
  0xda   :  { %v230_v33 = vpop.eup %229 }
  0xdb   :  { %v125_v34 = vadd.f32 1.0, %v230_v33 }
  0xdd   :  { %231 = vrcp.f32 %v125_v34 }
  0xea   :  { %v232_v35 = vpop.eup %231 }
  0xeb   :  { %v133_v39 = vmul.f32 %v232_v35, %v131_v38 }
 0x14b   :  { %v136_v36 = vpop.permute.xlu0 %135 }
 0x14c   :  { %v138_v37 = vmul.f32 %v232_v35, %v136_v36 }
 0x14e   :  { %140 = vrot.lane.b32.xlu1 %v138_v37, %s263_s1 }
 0x1c0   :  { %v141_v40 = vpop.permute.xlu1 %140 }
 0x1c1   :  { %v143_v41 = vadd.f32 %v141_v40, %v133_v39 }
 0x1c3   :  { %233 = vtanh.f32 %v143_v41 }
 0x1d0   :  { %v234_v42 = vpop.eup %233 }
 0x1d1   :  { %146 = vrot.lane.b32.xlu1 %v234_v42, %s265_s2 }
 0x1d5   :  { %152 = vrot.lane.b32.xlu1 %v151_v43, %s266_s29 }
 0x243   :  { %v147_v44 = vpop.permute.xlu1 %146 }
 0x244   :  { %v149_v45 = vmul.f32 %v232_v35, %v147_v44 }
 0x246   :  { %176 = vrot.lane.b32.xlu0 %v149_v45, %s267_s30 }
 0x247   :  { %v153_v46 = vpop.permute.xlu1 %152 }
 0x248   :  { %v155_v47 = vmul.f32 %v153_v46, %v149_v45 }
 0x24a   :  { %181 = vrot.lane.b32.xlu0 %v143_v41, %s268_s5  ;;  %157 = vrot.lane.b32.xlu1 %v155_v47, %s267_s30 }
 0x2b8   :  { %v177_v48 = vpop.permute.xlu0 %176 }
 0x2b9   :  { %179 = vst.msk [vmem:[%s331_s4] sm:$0x1] %vm160_vm4, %v177_v48 }
 0x2bc   :  { %v182_v49 = vpop.permute.xlu0 %181  ;;  %v158_v50 = vpop.permute.xlu1 %157 }
 0x2bd   :  { %184 = vst.msk [vmem:[%s331_s4 + $0x1] sm:$0x1] %vm160_vm4, %v182_v49  ;;  %v161_v51 = vsel %vm160_vm4, %v158_v50, 0.0 }
 0x2be   :  { %162 = vadd.xlane.f32.xlu1 %v161_v51 }
 0x347   :  { %v163_v53 = vpop.xlane.xlu1 %162 }
 0x348   :  { %v166_v54 = vadd.f32 %v164_v52, %v163_v53 }
 0x34a   :  { %v205_v55 = vmul.f32 -1.442695, %v166_v54 }
 0x34c   :  { %235 = vpow2.f32 %v205_v55 }
 0x359   :  { %v236_v56 = vpop.eup %235 }
 0x35a   :  { %v170_v57 = vadd.f32 1.0, %v236_v56 }
 0x35c   :  { %237 = vrcp.f32 %v170_v57 }
 0x369   :  { %v238_v58 = vpop.eup %237 }
 0x36a   :  { %174 = vst.msk [vmem:[#allocation2] sm:$0x1] %vm173_vm5, %v238_v58 }
 0x36b   :  { %250 = shalt.err (!%p247_p4)
}
 0x36c   :  { %194 = dma.vmem_to_hbm [thread:$0]  %s192_s11, 16, %s330_s3, [#allocation3]  }
 0x36d   :  { %259 = dma.done.wait [#allocation3], 16  }
 0x36e   :  { %260 = vsyncadd [#allocation3], 4294967280 }
 0x36f   :  { %202 = vsyncpa [#allocation3], 1 }

</bundles_post_ra>
